<compile_context>
chip_gen: v6e
topology: v6e:2x2x1
jax: 0.10.0
libtpu: 0.0.40
codegen_flags: <defaults>
</compile_context>

<pallas_src>
import jax
import jax.numpy as jnp
from jax.experimental import pallas as pl
from jax.experimental.pallas import tpu as pltpu

BN_EPS = 1e-5


def mlp_bn_kernel(x_ref, w1_ref, b1_ref, g_ref, beta_ref, w2_ref, b2_ref, o_ref):
    # x: (B, F)   w1: (F, tH)   b1/g/beta/w2: (1, tH)   b2: (1, 1)   out: (1, B)
    hi = pl.program_id(0)

    # Initialize the resident (1, B) accumulator with the final bias.
    @pl.when(hi == 0)
    def _init():
        o_ref[...] = jnp.broadcast_to(b2_ref[...], o_ref.shape).astype(o_ref.dtype)

    # Linear 1 (MXU): (B, F) @ (F, tH)
    h = jnp.dot(x_ref[...], w1_ref[...], preferred_element_type=jnp.float32) + b1_ref[...]

    # BatchNorm1d (training mode: batch mean, biased variance), affine folded
    # into one per-column scale/shift pair.
    mean = jnp.mean(h, axis=0, keepdims=True)
    centered = h - mean
    var = jnp.mean(centered * centered, axis=0, keepdims=True)
    scale = jax.lax.rsqrt(var + BN_EPS) * g_ref[...]
    shift = beta_ref[...] - mean * scale
    hn = h * scale + shift

    # Sigmoid: exp and approximate reciprocal both run on the EUP slot.
    s = pl.reciprocal(1.0 + jnp.exp(-hn), approx=True)

    # Linear 2 (H -> 1) as VPU broadcast-multiply + lane reduction; accumulate
    # this H-tile's contribution into the lane-dense output row.
    partial = jnp.sum(s * w2_ref[...], axis=-1, keepdims=True)      # (B, 1)
    o_ref[...] += partial.reshape(1, -1)                            # (1, B)


def model_1_forward(x, params, *, h_tile=None):
    """x: (B, F) float32 -> (B, 1) float32."""
    w1t, b1, gamma, beta, w2row, b2 = params
    B, F = x.shape
    H = w1t.shape[1]

    if h_tile is None:
        h_tile = H if H <= 512 else 512
    assert H % h_tile == 0, "hidden dim must be divisible by the H tile"
    n_h = H // h_tile

    # Working-set estimate (double-buffered DMA windows + elementwise temps).
    f32_bytes = 4
    est = f32_bytes * (
        2 * (B * F + F * h_tile + 4 * h_tile + 1 + B)
        + 4 * B * h_tile
    )
    vmem_limit = int(max(min(2 * est + (1 << 20), 48 << 20), 4 << 20))

    out_row = pl.pallas_call(
        mlp_bn_kernel,
        out_shape=jax.ShapeDtypeStruct((1, B), jnp.float32),
        grid_spec=pltpu.PrefetchScalarGridSpec(
            num_scalar_prefetch=0,
            grid=(n_h,),
            in_specs=[
                pl.BlockSpec((B, F), lambda hi: (0, 0)),        # x (stays resident)
                pl.BlockSpec((F, h_tile), lambda hi: (0, hi)),  # w1 column tile
                pl.BlockSpec((1, h_tile), lambda hi: (0, hi)),  # b1
                pl.BlockSpec((1, h_tile), lambda hi: (0, hi)),  # gamma
                pl.BlockSpec((1, h_tile), lambda hi: (0, hi)),  # beta
                pl.BlockSpec((1, h_tile), lambda hi: (0, hi)),  # w2 row tile
                pl.BlockSpec((1, 1), lambda hi: (0, 0)),        # b2
            ],
            out_specs=pl.BlockSpec((1, B), lambda hi: (0, 0)),  # resident accumulator
        ),
        compiler_params=pltpu.CompilerParams(
            dimension_semantics=("arbitrary",),   # reduction axis: output accumulates
            vmem_limit_bytes=vmem_limit,
        ),
    )(x, w1t, b1, gamma, beta, w2row, b2)

    # Lane-dense (1, B) row -> (B, 1) column expected by the PyTorch module.
    return out_row.reshape(B, 1)


def xavier_uniform(key, shape):
    # shape = (out_features, in_features), PyTorch convention
    fan_out, fan_in = shape
    bound = (6.0 / (fan_in + fan_out)) ** 0.5
    return jax.random.uniform(key, shape, jnp.float32, -bound, bound)


def init_params(key, num_features, num_hidden):
    k1, k2 = jax.random.split(key)
    w1 = xavier_uniform(k1, (num_hidden, num_features))      # nn.Linear(F, H).weight
    b1 = jnp.zeros((1, num_hidden), jnp.float32)             # zero-init bias
    gamma = jnp.ones((1, num_hidden), jnp.float32)           # BatchNorm1d weight
    beta = jnp.zeros((1, num_hidden), jnp.float32)           # BatchNorm1d bias
    w2 = xavier_uniform(k2, (1, num_hidden))                 # nn.Linear(H, 1).weight, kept as (1, H) row
    b2 = jnp.zeros((1, 1), jnp.float32)                      # zero-init bias
    # Pre-transpose w1 so the kernel does a row-major (B,F)@(F,H) matmul.
    return (w1.T, b1, gamma, beta, w2, b2)


if __name__ == "__main__":
    num_features, num_hidden, batch = 16, 32, 8
    key = jax.random.PRNGKey(0)
    kx, kp = jax.random.split(key)

    x = jax.random.normal(kx, (batch, num_features), jnp.float32)
    params = init_params(kp, num_features, num_hidden)

    out = model_1_forward(x, params)
    jax.block_until_ready(out)
    assert out.shape == (batch, 1) and out.dtype == jnp.float32
    print("KERNEL_OK")
</pallas_src>

<mosaic_0001>
module attributes {stable_mosaic.version = 11 : i64} {
  func.func @mlp_bn_kernel(%arg0: i32, %arg1: memref<8x16xf32, #tpu.memory_space<vmem>>, %arg2: memref<16x32xf32, #tpu.memory_space<vmem>>, %arg3: memref<1x32xf32, #tpu.memory_space<vmem>>, %arg4: memref<1x32xf32, #tpu.memory_space<vmem>>, %arg5: memref<1x32xf32, #tpu.memory_space<vmem>>, %arg6: memref<1x32xf32, #tpu.memory_space<vmem>>, %arg7: memref<1x1xf32, #tpu.memory_space<vmem>>, %arg8: memref<1x8xf32, #tpu.memory_space<vmem>>) attributes {dimension_semantics = [#tpu.dimension_semantics<arbitrary>], iteration_bounds = array<i64: 1>, scalar_prefetch = 0 : i64, scratch_operands = 0 : i64, tpu.core_type = #tpu.core_type<tc>, window_params = [{pipeline_mode = #tpu.pipeline_mode<synchronous>, transform_indices = @transform_0, window_bounds = array<i64: 8, 16>}, {transform_indices = @transform_1, window_bounds = array<i64: 16, 32>}, {transform_indices = @transform_2, window_bounds = array<i64: 1, 32>}, {transform_indices = @transform_3, window_bounds = array<i64: 1, 32>}, {transform_indices = @transform_4, window_bounds = array<i64: 1, 32>}, {transform_indices = @transform_5, window_bounds = array<i64: 1, 32>}, {pipeline_mode = #tpu.pipeline_mode<synchronous>, transform_indices = @transform_6, window_bounds = array<i64: 1, 1>}, {pipeline_mode = #tpu.pipeline_mode<synchronous>, transform_indices = @transform_7, window_bounds = array<i64: 1, 8>}]} {
    %c0_i32 = arith.constant 0 : i32
    %0 = arith.cmpi eq, %arg0, %c0_i32 : i32
    %1 = arith.extui %0 : i1 to i32
    %c0_i32_0 = arith.constant 0 : i32
    %2 = arith.cmpi ne, %1, %c0_i32_0 : i32
    scf.if %2 {
      %c0_24 = arith.constant 0 : index
      %c0_25 = arith.constant 0 : index
      %47 = vector.load %arg7[%c0_24, %c0_25] : memref<1x1xf32, #tpu.memory_space<vmem>>, vector<1x1xf32>
      %48 = vector.shape_cast %47 : vector<1x1xf32> to vector<1x1xf32>
      %49 = vector.broadcast %48 : vector<1x1xf32> to vector<1x8xf32>
      %c0_26 = arith.constant 0 : index
      %c0_27 = arith.constant 0 : index
      %50 = vector.load %arg8[%c0_26, %c0_27] : memref<1x8xf32, #tpu.memory_space<vmem>>, vector<1x8xf32>
      tpu.vector_store %arg8[%c0_26, %c0_27], %49 {strides = array<i32>} : memref<1x8xf32, #tpu.memory_space<vmem>>, vector<1x8xf32>,
    } else {
    }
    %c0 = arith.constant 0 : index
    %c0_1 = arith.constant 0 : index
    %3 = vector.load %arg1[%c0, %c0_1] : memref<8x16xf32, #tpu.memory_space<vmem>>, vector<8x16xf32>
    %c0_2 = arith.constant 0 : index
    %c0_3 = arith.constant 0 : index
    %4 = vector.load %arg2[%c0_2, %c0_3] : memref<16x32xf32, #tpu.memory_space<vmem>>, vector<16x32xf32>
    %cst = arith.constant dense<0.000000e+00> : vector<8x32xf32>
    %5 = tpu.matmul %3, %4, %cst {dimension_numbers = #tpu.dot_dimension_numbers<[1], [0], [0], [1], [0, 0, 1, 1], [], []>} : vector<8x16xf32>, vector<16x32xf32>, vector<8x32xf32> -> vector<8x32xf32>
    %c0_4 = arith.constant 0 : index
    %c0_5 = arith.constant 0 : index
    %6 = vector.load %arg3[%c0_4, %c0_5] : memref<1x32xf32, #tpu.memory_space<vmem>>, vector<1x32xf32>
    %7 = vector.broadcast %6 : vector<1x32xf32> to vector<8x32xf32>
    %8 = arith.addf %5, %7 : vector<8x32xf32>
    %cst_6 = arith.constant dense<0.000000e+00> : vector<32xf32>
    %9 = vector.multi_reduction <add>, %8, %cst_6 [0] : vector<8x32xf32> to vector<32xf32>
    %10 = vector.shape_cast %9 : vector<32xf32> to vector<1x32xf32>
    %cst_7 = arith.constant 8.000000e+00 : f32
    %11 = vector.broadcast %cst_7 : f32 to vector<1x32xf32>
    %12 = arith.divf %10, %11 : vector<1x32xf32>
    %13 = vector.broadcast %12 : vector<1x32xf32> to vector<8x32xf32>
    %14 = arith.subf %8, %13 : vector<8x32xf32>
    %15 = arith.mulf %14, %14 : vector<8x32xf32>
    %cst_8 = arith.constant dense<0.000000e+00> : vector<32xf32>
    %16 = vector.multi_reduction <add>, %15, %cst_8 [0] : vector<8x32xf32> to vector<32xf32>
    %17 = vector.shape_cast %16 : vector<32xf32> to vector<1x32xf32>
    %cst_9 = arith.constant 8.000000e+00 : f32
    %18 = vector.broadcast %cst_9 : f32 to vector<1x32xf32>
    %19 = arith.divf %17, %18 : vector<1x32xf32>
    %cst_10 = arith.constant 9.99999974E-6 : f32
    %20 = vector.broadcast %cst_10 : f32 to vector<1x32xf32>
    %21 = arith.addf %19, %20 : vector<1x32xf32>
    %22 = math.rsqrt %21 : vector<1x32xf32>
    %c0_11 = arith.constant 0 : index
    %c0_12 = arith.constant 0 : index
    %23 = vector.load %arg4[%c0_11, %c0_12] : memref<1x32xf32, #tpu.memory_space<vmem>>, vector<1x32xf32>
    %24 = arith.mulf %22, %23 : vector<1x32xf32>
    %c0_13 = arith.constant 0 : index
    %c0_14 = arith.constant 0 : index
    %25 = vector.load %arg5[%c0_13, %c0_14] : memref<1x32xf32, #tpu.memory_space<vmem>>, vector<1x32xf32>
    %26 = arith.mulf %12, %24 : vector<1x32xf32>
    %27 = arith.subf %25, %26 : vector<1x32xf32>
    %28 = vector.broadcast %24 : vector<1x32xf32> to vector<8x32xf32>
    %29 = arith.mulf %8, %28 : vector<8x32xf32>
    %30 = vector.broadcast %27 : vector<1x32xf32> to vector<8x32xf32>
    %31 = arith.addf %29, %30 : vector<8x32xf32>
    %cst_15 = arith.constant 0.000000e+00 : f32
    %32 = vector.broadcast %cst_15 : f32 to vector<8x32xf32>
    %33 = arith.subf %32, %31 : vector<8x32xf32>
    %34 = math.exp %33 : vector<8x32xf32>
    %cst_16 = arith.constant 1.000000e+00 : f32
    %35 = vector.broadcast %cst_16 : f32 to vector<8x32xf32>
    %36 = arith.addf %35, %34 : vector<8x32xf32>
    %37 = tpu.reciprocal %36 {approx = true} : vector<8x32xf32> -> vector<8x32xf32>
    %c0_17 = arith.constant 0 : index
    %c0_18 = arith.constant 0 : index
    %38 = vector.load %arg6[%c0_17, %c0_18] : memref<1x32xf32, #tpu.memory_space<vmem>>, vector<1x32xf32>
    %39 = vector.broadcast %38 : vector<1x32xf32> to vector<8x32xf32>
    %40 = arith.mulf %37, %39 : vector<8x32xf32>
    %cst_19 = arith.constant dense<0.000000e+00> : vector<8xf32>
    %41 = vector.multi_reduction <add>, %40, %cst_19 [1] : vector<8x32xf32> to vector<8xf32>
    %42 = vector.shape_cast %41 : vector<8xf32> to vector<8x1xf32>
    %c0_20 = arith.constant 0 : index
    %c0_21 = arith.constant 0 : index
    %43 = vector.load %arg8[%c0_20, %c0_21] : memref<1x8xf32, #tpu.memory_space<vmem>>, vector<1x8xf32>
    %44 = vector.shape_cast %42 : vector<8x1xf32> to vector<1x8xf32>
    %45 = arith.addf %43, %44 : vector<1x8xf32>
    %c0_22 = arith.constant 0 : index
    %c0_23 = arith.constant 0 : index
    %46 = vector.load %arg8[%c0_22, %c0_23] : memref<1x8xf32, #tpu.memory_space<vmem>>, vector<1x8xf32>
    tpu.vector_store %arg8[%c0_22, %c0_23], %45 {strides = array<i32>} : memref<1x8xf32, #tpu.memory_space<vmem>>, vector<1x8xf32>,
    return
  }
  func.func @transform_0(%arg0: i32) -> (i32, i32) {
    %c0_i32 = arith.constant 0 : i32
    %c0_i32_0 = arith.constant 0 : i32
    %c0_i32_1 = arith.constant 0 : i32
    return %c0_i32, %c0_i32_0 : i32, i32
  }
  func.func @transform_1(%arg0: i32) -> (i32, i32) {
    %c0_i32 = arith.constant 0 : i32
    %c0_i32_0 = arith.constant 0 : i32
    return %c0_i32, %arg0 : i32, i32
  }
  func.func @transform_2(%arg0: i32) -> (i32, i32) {
    %c0_i32 = arith.constant 0 : i32
    %c0_i32_0 = arith.constant 0 : i32
    return %c0_i32, %arg0 : i32, i32
  }
  func.func @transform_3(%arg0: i32) -> (i32, i32) {
    %c0_i32 = arith.constant 0 : i32
    %c0_i32_0 = arith.constant 0 : i32
    return %c0_i32, %arg0 : i32, i32
  }
  func.func @transform_4(%arg0: i32) -> (i32, i32) {
    %c0_i32 = arith.constant 0 : i32
    %c0_i32_0 = arith.constant 0 : i32
    return %c0_i32, %arg0 : i32, i32
  }
  func.func @transform_5(%arg0: i32) -> (i32, i32) {
    %c0_i32 = arith.constant 0 : i32
    %c0_i32_0 = arith.constant 0 : i32
    return %c0_i32, %arg0 : i32, i32
  }
  func.func @transform_6(%arg0: i32) -> (i32, i32) {
    %c0_i32 = arith.constant 0 : i32
    %c0_i32_0 = arith.constant 0 : i32
    %c0_i32_1 = arith.constant 0 : i32
    return %c0_i32, %c0_i32_0 : i32, i32
  }
  func.func @transform_7(%arg0: i32) -> (i32, i32) {
    %c0_i32 = arith.constant 0 : i32
    %c0_i32_0 = arith.constant 0 : i32
    %c0_i32_1 = arith.constant 0 : i32
    return %c0_i32, %c0_i32_0 : i32, i32
  }
}

</mosaic_0001>

<bundles_post_ra>
// kernel: tpu_custom_call.1
= control target key start
LH: loop header
LB: loop body
LE: loop exit
PB: predicated region body
PF: predicated region fallthrough
CT: control target
= control target key end

     0   :  { %s524_s0 = inlined_call_operand.hbm [shape: f32[8,16], index: 0, kind: input, shape index: {}]   ;;  %s525_s1 = inlined_call_operand.hbm [shape: f32[16,32], index: 1, kind: input, shape index: {}]   ;;  %s526_s2 = inlined_call_operand.vmem [shape: f32[1,32], index: 2, kind: input, shape index: {}]   ;;  %s527_s3 = inlined_call_operand.vmem [shape: f32[1,32], index: 3, kind: input, shape index: {}]   ;;  %s528_s4 = inlined_call_operand.vmem [shape: f32[1,32], index: 4, kind: input, shape index: {}]   ;;  %s529_s5 = inlined_call_operand.vmem [shape: f32[1,32], index: 5, kind: input, shape index: {}]   ;;  %s530_s6 = inlined_call_operand.<no memory space> [shape: f32[1,1], index: 6, kind: input, shape index: {}]   ;;  %s531_s7 = inlined_call_operand.hbm [shape: f32[1,8], index: 7, kind: output, shape index: {}]  }
   0x1   :  { %v12_v0 = vstv %s530_s6 }
   0x2   :  { %13 = vst [vmem:[#allocation2] sm:$0x1] %v12_v0 }
   0x3   :  { %14 = vsyncpa [#allocation4], 0 }
   0x4   :  { %15 = vsyncpa [#allocation7], 0 }
   0x5   :  { %16 = vsyncpa [#allocation5], 0  ;;  %s432_s26 = smov [#allocation3]   ;;  %s433_s28 = smov [#allocation6]  }
   0x6   :  { %s23_s27 = sshll.u32 %s432_s26, 4  ;;  %s32_s29 = sshll.u32 %s433_s28, 4  ;;  %s24_s27 = int_to_ptr.vmem [resolvable:$true] %s23_s27  ;;  %s33_s29 = int_to_ptr.vmem [resolvable:$true] %s32_s29 }
   0x7   :  { %s374_s30 = scalar_lea.vmem %s24_s27, 128  ;;  %p379_p1 = scmp.lt.s32.totalorder %s24_s27, %s24_s27 }
   0x8   :  { %p375_p0 = scmp.ne.s32.totalorder %s24_s27, %s374_s30  ;;  %p380_p2 = scmp.lt.s32.totalorder %s374_s30, %s374_s30 }
   0xa   :  { %p381_p3 = por %p380_p2, %p379_p1 }
   0xc   :  { %p382_p4 = pnand %p381_p3, %p375_p0 }
   0xe   :  { %385 = shalt.err (!%p382_p4)
}
   0xf   :  { %26 = dma.hbm_to_vmem [thread:$0]  %s524_s0, 128, %s24_s27, [#allocation4]  }
  0x10   :  { %s394_s6 = scalar_lea.vmem %s33_s29, 256  ;;  %p399_p6 = scmp.lt.s32.totalorder %s33_s29, %s33_s29 }
  0x11   :  { %p395_p5 = scmp.ne.s32.totalorder %s33_s29, %s394_s6  ;;  %p400_p7 = scmp.lt.s32.totalorder %s394_s6, %s394_s6 }
  0x13   :  { %p401_p8 = por %p400_p7, %p399_p6 }
  0x15   :  { %p402_p9 = pnand %p401_p8, %p395_p5 }
  0x17   :  { %405 = shalt.err (!%p402_p9)
}
  0x18   :  { %s434_s10 = smov 128   ;;  %s435_s11 = smov 8  }
  0x19   :  { %38 = dma.hbm_to_vmem [thread:$0]  %s525_s1, 256, %s33_s29, [#allocation7], %s434_s10, %s434_s10, %s435_s11  }
  0x1a   :  { %426 = dma.done.wait [#allocation4], 128  }
  0x1b   :  { %427 = vsyncadd [#allocation4], 4294967168 }
  0x1c   :  { %428 = dma.done.wait [#allocation7], 256  }
  0x1d   :  { %429 = vsyncadd [#allocation7], 4294967040  ;;  %v436_v1 = vmov 0.0   ;;  %vm437_vm0 = vmmov 0   ;;  %v73_v2 = vld [vmem:[#allocation6 + $0x8] sm:$0xff]  ;;  %v72_v3 = vld [vmem:[#allocation6] sm:$0xff]  ;;  %v65_v28 = vlaneseq }
  0x1e   :  { %342 = vmatprep.subr.mxu0 %v436_v1  ;;  %346 = vmatprep.mubr.msk.f32.mxu0 %vm437_vm0, %v436_v1  ;;  %v71_v4 = vld [vmem:[#allocation3] sm:$0xff]  ;;  %vm81_vm1 = vcmask 130048   ;;  %v336_v5 = vld [vmem:[%s526_s2] ss:$0 sm:$0xff]  ;;  %vm155_vm2 = vcmask 261120   ;;  %v438_v49 = vmov 0  }
  0x1f   :  { %343 = vmatpush3.msra.mxu0 %v73_v2  ;;  %v496_v29 = vshrl.u32 %v65_v28, 7  ;;  %v177_v30 = vld [vmem:[%s527_s3] sm:$0x1]  ;;  %358 = vset.pattern.permute.xlu0 %v438_v49  ;;  %v439_v51 = vmov 1966171168   ;;  %vm69_vm3 = vcmask 57344  }
  0x20   :  { %344 = vmatprep.subr.mxu0 %v436_v1  ;;  %v179_v34 = vld [vmem:[%s528_s4] sm:$0x1]  ;;  %359 = vset.pattern.permute.xlu1 %v438_v49  ;;  %v249_v52 = vunpack.c.l.s4 %v439_v51  ;;  %s440_s4 = smov [#allocation8]  }
  0x21   :  { %345 = vmatpush3.msra.mxu0 %v72_v3  ;;  %v67_v31 = vsub.s32 0, %v496_v29  ;;  %v338_v45 = vld [vmem:[%s529_s5] ss:$0 sm:$0xff]  ;;  %v218_v54 = vsub.s32 1, %v496_v29  ;;  %v222_v55 = vsub.s32 2, %v496_v29  ;;  %v226_v56 = vsub.s32 3, %v496_v29 }
  0x22   :  { %347 = vmatmul.mubr.msk.f32.vlgmr.msra.gmra.mxu0 %vm81_vm1, %v71_v4  ;;  %v59_v50 = vld [vmem:[#allocation2] sm:$0x1]  ;;  %v250_v53 = vunpack.c.0.s8 %v249_v52  ;;  %v230_v57 = vsub.s32 4, %v496_v29  ;;  %v234_v58 = vsub.s32 5, %v496_v29  ;;  %v238_v59 = vsub.s32 6, %v496_v29  ;;  %s326_s5 = sshll.u32 %s440_s4, 4  ;;  %s327_s5 = int_to_ptr.vmem [resolvable:$true] %s326_s5 }
  0x23   :  { %v242_v60 = vsub.s32 7, %v496_v29  ;;  %s406_s18 = scalar_lea.vmem %s327_s5, 16  ;;  %s410_s19 = scalar_lea.vmem %s327_s5, 32 }
  0x24   :  { %v253_v62 = vsub.s32 %v250_v53, %v496_v29  ;;  %p407_p10 = scmp.ne.s32.totalorder %s327_s5, %s406_s18  ;;  %p411_p11 = scmp.lt.s32.totalorder %s327_s5, %s327_s5 }
  0x25   :  { %p412_p12 = scmp.lt.s32.totalorder %s410_s19, %s406_s18 }
  0x27   :  { %p413_p13 = por %p412_p12, %p411_p11 }
  0x29   :  { %p414_p0 = pnand %p413_p13, %p407_p10 }
  0xe2   :  { %v151_v6 = vpop.f32.mrf.mxu0 }
  0xe3   :  { %v152_v7 = vadd.f32 %v336_v5, %v151_v6 }
  0xe4   :  { %v348_v8 = vpop.f32.mrf.mxu0 }
  0xe5   :  { %v156_v9 = vsel %vm155_vm2, %v152_v7, 0.0 }
  0xe6   :  { %v157_v10 = vrot.slane %v156_v9, 4 }
  0xe8   :  { %v158_v11 = vadd.f32 %v157_v10, %v156_v9 }
  0xea   :  { %v159_v12 = vrot.slane %v158_v11, 2 }
  0xec   :  { %v160_v13 = vadd.f32 %v159_v12, %v158_v11 }
  0xee   :  { %v161_v14 = vrot.slane %v160_v13, 1 }
  0xf0   :  { %v162_v15 = vadd.f32 %v161_v14, %v160_v13 }
  0xf2   :  { %v164_v16 = vmul.f32 0.125, %v162_v15 }
  0xf4   :  { %v165_v17 = vsub.f32 %v152_v7, %v164_v16 }
  0xf6   :  { %v166_v18 = vmul.f32 %v165_v17, %v165_v17 }
  0xf8   :  { %v167_v19 = vsel %vm155_vm2, %v166_v18, 0.0 }
  0xf9   :  { %v168_v20 = vrot.slane %v167_v19, 4 }
  0xfb   :  { %v169_v21 = vadd.f32 %v168_v20, %v167_v19 }
  0xfd   :  { %v170_v22 = vrot.slane %v169_v21, 2 }
  0xff   :  { %v171_v23 = vadd.f32 %v170_v22, %v169_v21  ;;  %v297_v22 = vand.u32 127, %v65_v28 }
 0x101   :  { %v172_v24 = vrot.slane %v171_v23, 1 }
 0x103   :  { %v173_v25 = vadd.f32 %v172_v24, %v171_v23  ;;  %v300_v23 = vsub.s32 %v297_v22, %v496_v29 }
 0x105   :  { %v174_v26 = vmul.f32 0.125, %v173_v25 }
 0x107   :  { %v175_v27 = vadd.f32 1e-05, %v174_v26 }
 0x109   :  { %360 = vrsqrt.f32 %v175_v27 }
 0x116   :  { %v361_v32 = vpop.eup %360 }
 0x117   :  { %v178_v33 = vmul.f32 %v361_v32, %v177_v30 }
 0x119   :  { %v180_v35 = vmul.f32 %v178_v33, %v164_v16  ;;  %v185_v36 = vrot.slane %v178_v33, %v67_v31 }
 0x11b   :  { %v181_v37 = vsub.f32 %v179_v34, %v180_v35  ;;  %v186_v38 = vmul.f32 %v185_v36, %v152_v7 }
 0x11d   :  { %v191_v39 = vrot.slane %v181_v37, %v67_v31 }
 0x11f   :  { %v193_v40 = vadd.f32 %v191_v39, %v186_v38 }
 0x121   :  { %v194_v41 = vsub.f32 0.0, %v193_v40 }
 0x123   :  { %v195_v42 = vmul.f32 1.442695, %v194_v41 }
 0x125   :  { %362 = vpow2.f32 %v195_v42 }
 0x132   :  { %v363_v43 = vpop.eup %362 }
 0x133   :  { %v197_v44 = vadd.f32 1.0, %v363_v43 }
 0x135   :  { %364 = vrcp.f32 %v197_v44 }
 0x142   :  { %v365_v46 = vpop.eup %364 }
 0x143   :  { %v206_v47 = vmul.f32 %v365_v46, %v338_v45 }
 0x145   :  { %v207_v48 = vsel %vm155_vm2, %v206_v47, 0.0 }
 0x146   :  { %208 = vadd.xlane.f32.xlu0 %v207_v48 }
 0x15c   :  { %62 = vperm.xlu0 %358, %v59_v50  }
 0x1cf   :  { %v209_v61 = vpop.xlane.xlu0 %208 }
 0x1d0   :  { %v215_v63 = vrot.slane %v209_v61, %v67_v31  ;;  %v219_v0 = vrot.slane %v209_v61, %v218_v54  ;;  %v223_v1 = vrot.slane %v209_v61, %v222_v55  ;;  %v227_v2 = vrot.slane %v209_v61, %v226_v56 }
 0x1d1   :  { %v231_v3 = vrot.slane %v209_v61, %v230_v57  ;;  %v235_v4 = vrot.slane %v209_v61, %v234_v58  ;;  %v239_v5 = vrot.slane %v209_v61, %v238_v59  ;;  %v243_v6 = vrot.slane %v209_v61, %v242_v60 }
 0x1d2   :  { %v244_v7 = vcombine.low %v215_v63, %v219_v0  ;;  %v245_v8 = vcombine.low %v223_v1, %v227_v2 }
 0x1d3   :  { %v246_v9 = vcombine.low %v231_v3, %v235_v4  ;;  %v247_v10 = vcombine.low %v239_v5, %v243_v6 }
 0x1d4   :  { %v254_v11 = vrot.slane %v244_v7, %v253_v62  ;;  %v261_v12 = vrot.slane %v245_v8, %v253_v62 }
 0x1d5   :  { %v268_v13 = vrot.slane %v246_v9, %v253_v62  ;;  %v275_v14 = vrot.slane %v247_v10, %v253_v62 }
 0x1d6   :  { %v276_v15 = vcombine.low %v254_v11, %v261_v12 }
 0x1d7   :  { %v277_v16 = vcombine.low %v268_v13, %v275_v14  ;;  %v63_v17 = vpop.permute.xlu0 %62 }
 0x1d8   :  { %v284_v18 = vrot.slane %v276_v15, %v253_v62  ;;  %v68_v19 = vrot.slane %v63_v17, %v67_v31 }
 0x1d9   :  { %v291_v20 = vrot.slane %v277_v16, %v253_v62 }
 0x1da   :  { %70 = vst.msk [vmem:[#allocation8] sm:$0x1] %vm69_vm3, %v68_v19 }
 0x1db   :  { %v292_v21 = vcombine.low %v284_v18, %v291_v20 }
 0x1dd   :  { %294 = vperm.xlu1 %359, %v292_v21  }
 0x1e1   :  { %v210_v27 = vld [vmem:[#allocation8] sm:$0x1] }
 0x258   :  { %v295_v24 = vpop.permute.xlu1 %294 }
 0x259   :  { %v301_v25 = vrot.slane %v295_v24, %v300_v23 }
 0x25b   :  { %v308_v26 = vrot.slane %v301_v25, %v253_v62 }
 0x25d   :  { %v315_v30 = vrot.slane %v308_v26, %v253_v62 }
 0x25f   :  { %v317_v32 = vadd.f32 %v315_v30, %v210_v27 }
 0x261   :  { %319 = vst.msk [vmem:[#allocation8] sm:$0x1] %vm69_vm3, %v317_v32 }
 0x262   :  { %417 = shalt.err (!%p414_p0)
}
 0x263   :  { %329 = dma.vmem_to_hbm [thread:$0]  %s327_s5, 16, %s531_s7, [#allocation5]  }
 0x264   :  { %430 = dma.done.wait [#allocation5], 16  }
 0x265   :  { %431 = vsyncadd [#allocation5], 4294967280 }
 0x266   :  { %333 = vsyncpa [#allocation4], 1 }
 0x267   :  { %334 = vsyncpa [#allocation7], 1 }
 0x268   :  { %335 = vsyncpa [#allocation5], 1 }

</bundles_post_ra>
